<compile_context>
chip_gen: v6e
topology: v6e:2x2x1
jax: 0.10.0
libtpu: 0.0.40
codegen_flags: <defaults>
</compile_context>

<pallas_src>
import functools

import numpy as np
import jax
import jax.numpy as jnp
from jax.experimental import pallas as pl
from jax.experimental.pallas import tpu as pltpu


def _round_up(v, m):
    return ((v + m - 1) // m) * m


# ----------------------------------------------------------------------------
# Generation-aware VMEM sizing
# ----------------------------------------------------------------------------
def _vmem_limits():
    phys = 128 * 1024 * 1024
    try:
        info = pltpu.get_tpu_info()
        phys = int(getattr(info, "vmem_capacity_bytes", phys)) or phys
    except Exception:
        pass
    # ~38 MiB on v7x (64 MiB phys), ~77 MiB on v5e/v6e (128 MiB phys).
    limit = max(32 * 1024 * 1024, min(96 * 1024 * 1024, int(phys * 0.6)))
    budget = int(limit * 0.7)
    return limit, budget


def _pick_tiles(c_in, c_out, k, l_out, mm_bytes, budget, tl_target):
    """Pick (TCo, TL) so every live buffer fits the VMEM budget."""
    cin8 = _round_up(c_in, 8)
    cip = _round_up(c_in, 128)
    l_need = _round_up(max(l_out, 1), 128)
    tl_cap = max(128, min(_round_up(tl_target, 128), l_need))

    def fits(tco, tl):
        tco8 = _round_up(tco, 8)
        tin = _round_up(tl + k - 1, 128)
        w_bytes = 2 * k * tco8 * cip * mm_bytes        # weight block (x2 buffers)
        vec_bytes = 2 * 2 * 4 * tco8                   # scale + bias rows (x2)
        x_bytes = 2 * 4 * cin8 * tin                   # f32 input slab (x2)
        q_bytes = 4 * cin8 * tin                       # f32 PACT temp
        slab_bytes = 4 * cip * tin                     # padded contraction slab
        rhs_bytes = mm_bytes * cip * tl                # per-tap matmul operand
        out_bytes = 2 * 4 * tco8 * tl + 4 * tco8 * tl  # out block (x2) + f32 acc
        total = (w_bytes + vec_bytes + x_bytes + q_bytes + slab_bytes
                 + rhs_bytes + out_bytes)
        return total <= budget

    tco = _round_up(c_out, 8)
    while tco > 8 and not fits(tco, 128):              # shrink channel tile first
        tco = _round_up(max(8, tco // 2), 8)
    tl = 128
    while tl * 2 <= tl_cap and fits(tco, tl * 2):      # then grow the length tile
        tl *= 2
    return tco, tl


# ----------------------------------------------------------------------------
# Pallas kernel: fused PACT quant + K-tap conv matmul + per-channel epilogue
# ----------------------------------------------------------------------------
def _pact_conv1d_kernel(x_ref, w_ref, scale_ref, b_ref, o_ref, slab_ref, *,
                        n_taps, tl, cin, cip, act_scale, inv_act_scale,
                        clip_val, int_domain, mm_dtype):
    # x_ref     : (C_in, TIN)  f32 input slab (one batch row, length tile + halo)
    # w_ref     : (K, TCo, CIP) matmul-dtype weights (lane-padded contraction)
    # scale_ref : (TCo, 1) f32 per-channel epilogue scale (s_w / act_scale)
    # b_ref     : (TCo, 1) f32 quantized bias
    # o_ref     : (TCo, TL) f32 output tile (channels x length -> NCL)
    # slab_ref  : (CIP, TIN) f32 scratch: quantized slab, zero-padded contraction
    x = x_ref[...]
    xq = jnp.clip(x, 0.0, clip_val)
    xq = jnp.floor(act_scale * xq)            # PACT integer code in [0, 2^abit - 1]
    if not int_domain:
        xq = xq * inv_act_scale               # dequantize (PACT, dequantize=True)

    if cip != cin:
        slab_ref[...] = jnp.zeros_like(slab_ref)   # zero the contraction padding
    slab_ref[0:cin, :] = xq

    acc = None
    for k in range(n_taps):                   # static unroll over kernel taps
        rhs = slab_ref[:, k:k + tl].astype(mm_dtype)
        part = jnp.dot(w_ref[k], rhs, preferred_element_type=jnp.float32)
        acc = part if acc is None else acc + part

    if int_domain:
        acc = acc * scale_ref[...]             # fold s_w[c] * (1 / act_scale)
    o_ref[...] = (acc + b_ref[...]).astype(o_ref.dtype)


def fused_pact_conv1d(x, w_taps, scale_ch, bias_ch, *, kernel_size, act_scale,
                      clip_val, int_domain, mm_dtype, tl_target=2048):
    """out[n,co,l] = scale[co] * sum_{ci,k} PACT(x)[n,ci,l+k] * w[k,co,ci] + b[co]."""
    N, C_in, L = x.shape
    K, C_out, C_in2 = w_taps.shape
    assert K == kernel_size and C_in2 == C_in
    L_out = L - K + 1
    assert L_out >= 1

    mm_bytes = jnp.dtype(mm_dtype).itemsize
    limit, budget = _vmem_limits()
    TCo, TL = _pick_tiles(C_in, C_out, K, L_out, mm_bytes, budget, tl_target)

    CIP = _round_up(C_in, 128)
    n_l = -(-L_out // TL)
    n_c = -(-_round_up(C_out, 8) // TCo)
    C_out_p = n_c * TCo
    Lp_out = n_l * TL
    TIN = TL + K - 1

    # Weights / bias / scale are tiny -> pad on the wrapper.
    w_p = jnp.zeros((K, C_out_p, CIP), mm_dtype).at[:, :C_out, :C_in].set(
        w_taps.astype(mm_dtype))
    b_p = jnp.zeros((C_out_p, 1), jnp.float32).at[:C_out, 0].set(bias_ch)
    s_p = jnp.zeros((C_out_p, 1), jnp.float32).at[:C_out, 0].set(scale_ch)

    # Activations: pad the length and replicate only the (K-1)-column halo per tile.
    pad = Lp_out - L_out
    x_pad = jnp.pad(x, ((0, 0), (0, 0), (0, pad))) if pad > 0 else x
    if n_l == 1:
        x_halo = x_pad[:, None, :, :]
    else:
        x_halo = jnp.stack(
            [x_pad[:, :, j * TL: j * TL + TIN] for j in range(n_l)], axis=1)
    # x_halo: (N, n_l, C_in, TIN)

    kernel = functools.partial(
        _pact_conv1d_kernel,
        n_taps=K, tl=TL, cin=C_in, cip=CIP,
        act_scale=float(act_scale), inv_act_scale=float(1.0 / act_scale),
        clip_val=float(clip_val), int_domain=bool(int_domain),
        mm_dtype=mm_dtype)

    out = pl.pallas_call(
        kernel,
        out_shape=jax.ShapeDtypeStruct((N, C_out_p, Lp_out), jnp.float32),
        grid=(N, n_c, n_l),
        in_specs=[
            pl.BlockSpec((None, None, C_in, TIN), lambda n, c, j: (n, j, 0, 0)),
            pl.BlockSpec((K, TCo, CIP), lambda n, c, j: (0, c, 0)),
            pl.BlockSpec((TCo, 1), lambda n, c, j: (c, 0)),
            pl.BlockSpec((TCo, 1), lambda n, c, j: (c, 0)),
        ],
        out_specs=pl.BlockSpec((None, TCo, TL), lambda n, c, j: (n, c, j)),
        scratch_shapes=[pltpu.VMEM((CIP, TIN), jnp.float32)],
        compiler_params=pltpu.CompilerParams(
            dimension_semantics=("parallel", "parallel", "parallel"),
            vmem_limit_bytes=limit),
    )(x_halo, w_p, s_p, b_p)

    if C_out_p != C_out or Lp_out != L_out:
        out = out[:, :C_out, :L_out]
    return out


# ----------------------------------------------------------------------------
# Quantization helpers (parameter-side glue, plain JAX)
# ----------------------------------------------------------------------------
def _bias_asym_min_max_quantize(b, bit=32):
    if b.shape[0] == 1:
        b_min = jnp.minimum(b.min(), 0.0)
        b_max = jnp.maximum(b.max(), 0.0)
    else:
        b_min, b_max = b.min(), b.max()
    s = (b_max - b_min) / (2.0 ** bit - 1.0)
    s = jnp.where(s == 0, 1.0, s)          # guard all-equal bias (torch would NaN)
    return jnp.round(b / s) * s


# ----------------------------------------------------------------------------
# Module
# ----------------------------------------------------------------------------
class QuantMultiPrecActivConv1d:
    """JAX re-implementation of the PyTorch module (fc=None, first_layer=False)."""

    def __init__(self, inplane, outplane, wbits, abits, kernel_size,
                 stride=1, padding=0, dilation=1, groups=1, key=None):
        assert stride == 1 and padding == 0 and dilation == 1 and groups == 1
        if isinstance(wbits, int):
            wbits = [wbits]
        if isinstance(abits, int):
            abits = [abits]
        self.inplane, self.outplane = inplane, outplane
        self.wbits, self.abits = list(wbits), list(abits)
        self.kernel_size = kernel_size
        self.tl_target = 2048

        if key is None:
            key = jax.random.PRNGKey(0)
        kw, kb = jax.random.split(key)
        fan_in = inplane * kernel_size
        bound = 1.0 / (fan_in ** 0.5)
        self.weight = jax.random.uniform(
            kw, (outplane, inplane, kernel_size), jnp.float32, -bound, bound)
        self.bias = jax.random.uniform(kb, (outplane,), jnp.float32, -bound, bound)

        # architecture params (filled with 0.01, requires_grad=False in torch).
        # alpha_activ stays numpy: activation-branch selection is static metadata.
        self.alpha_activ = np.full((len(self.abits),), 0.01, np.float32)
        self.alpha_weight = jnp.full((len(self.wbits), outplane), 0.01, jnp.float32)
        self.clip_val = 6.0  # init_act_clip_val

        # Static bound on |round(w / S_w)| over all candidate branches, used to
        # decide whether the integer-domain bf16 MXU path is bit-safe.
        self._w_int_abs_max = self._max_weight_int_magnitude()

        # bookkeeping buffers (no effect on output values)
        self.param_size = inplane * outplane * kernel_size / groups * 1e-6
        self.filter_size = self.param_size / float(stride ** 2.0)
        self.size_product = 0.0
        self.memory_size = 0.0

    # ------------------------- parameter-side helpers -------------------------
    def _max_weight_int_magnitude(self):
        w = np.asarray(self.weight, np.float32)
        flat = w.reshape(w.shape[0], -1)
        rng = flat.max(1) - flat.min(1)
        rng = np.where(rng == 0, np.float32(1.0), rng)
        amax = 0.0
        for bit in self.wbits:
            if bit == 0:
                continue
            s = rng / np.float32(2.0 ** bit - 1.0)
            amax = max(amax, float(np.max(np.abs(np.round(flat / s[:, None])))))
        return amax if amax > 0.0 else 1.0

    def _select_sw(self):
        # per-output-channel one-hot over the wbits branches
        return jax.nn.one_hot(jnp.argmax(self.alpha_weight, axis=0),
                              len(self.wbits), dtype=jnp.float32)  # (C_out, n_bits)

    def _channel_ranges(self):
        flat = self.weight.reshape(self.outplane, -1)
        rng = flat.max(axis=1) - flat.min(axis=1)
        return jnp.where(rng == 0, 1.0, rng)

    def _mixed_weight_dequant(self):
        sw, rng = self._select_sw(), self._channel_ranges()
        mix = jnp.zeros_like(self.weight)
        for i, bit in enumerate(self.wbits):
            if bit == 0:
                continue
            s = (rng / (2.0 ** bit - 1.0))[:, None, None]
            mix = mix + (jnp.round(self.weight / s) * s) * sw[:, i][:, None, None]
        return mix

    def _mixed_weight_int(self):
        sw, rng = self._select_sw(), self._channel_ranges()
        w_int = jnp.zeros_like(self.weight)
        s_ch = jnp.zeros((self.outplane,), jnp.float32)
        for i, bit in enumerate(self.wbits):
            if bit == 0:
                continue
            s = rng / (2.0 ** bit - 1.0)
            w_int = w_int + jnp.round(self.weight / s[:, None, None]) \
                * sw[:, i][:, None, None]
            s_ch = s_ch + s * sw[:, i]
        return w_int, s_ch

    # --------------------------------- forward --------------------------------
    def __call__(self, x):
        N, C_in, L = x.shape
        assert C_in == self.inplane

        # bookkeeping buffer updates (side effects only)
        self.memory_size = C_in * L * 0.001
        self.size_product = self.filter_size * L

        # QuantPaCTActiv: one-hot(argmax(alpha_activ)) selects one branch (static).
        abit = self.abits[int(np.argmax(self.alpha_activ))]
        act_scale = (2.0 ** abit - 1.0) / self.clip_val

        # Integer-domain MXU path only when it is exact in bf16 operands + f32 acc.
        a_max = 2.0 ** abit - 1.0
        w_max = self._w_int_abs_max + 1.0
        use_int = (abit <= 8 and w_max <= 256.0 and
                   C_in * self.kernel_size * a_max * w_max < 2.0 ** 24)

        qbias = _bias_asym_min_max_quantize(self.bias, 32)
        if use_int:
            w_mix, s_ch = self._mixed_weight_int()
            scale_ch = s_ch * jnp.float32(1.0 / act_scale)
            mm_dtype = jnp.bfloat16
        else:
            w_mix = self._mixed_weight_dequant()
            scale_ch = jnp.ones((self.outplane,), jnp.float32)
            mm_dtype = jnp.float32

        w_taps = jnp.transpose(w_mix, (2, 0, 1))     # (K, C_out, C_in)
        return fused_pact_conv1d(
            x, w_taps, scale_ch, qbias,
            kernel_size=self.kernel_size, act_scale=act_scale,
            clip_val=self.clip_val, int_domain=use_int, mm_dtype=mm_dtype,
            tl_target=self.tl_target)


# ----------------------------------------------------------------------------
# Pure-JAX reference (no Pallas) for a correctness sanity check
# ----------------------------------------------------------------------------
def _reference_forward(module, x):
    abit = module.abits[int(np.argmax(module.alpha_activ))]
    scale = (2.0 ** abit - 1.0) / module.clip_val
    xq = jnp.floor(scale * jnp.clip(x, 0.0, module.clip_val)) / scale
    mix_w = module._mixed_weight_dequant()
    qb = _bias_asym_min_max_quantize(module.bias, 32)
    out = jax.lax.conv_general_dilated(
        xq, mix_w, window_strides=(1,), padding="VALID",
        dimension_numbers=("NCH", "OIH", "NCH"),
        precision=jax.lax.Precision.HIGHEST)
    return out + qb[None, :, None]


if __name__ == "__main__":
    key = jax.random.PRNGKey(0)
    k1, k2, k3, k4 = jax.random.split(key, 4)

    # Case 1: tiny shapes, exercises the fused integer-domain bf16 MXU path.
    m1 = QuantMultiPrecActivConv1d(4, 8, wbits=[2, 4, 8], abits=[4, 8],
                                   kernel_size=3, key=k1)
    x1 = 3.0 * jax.random.normal(k2, (2, 4, 16), jnp.float32)
    o1 = m1(x1)
    jax.block_until_ready(o1)
    assert o1.shape == (2, 8, 16 - 3 + 1)
    r1 = _reference_forward(m1, x1)
    jax.block_until_ready(r1)
    np.testing.assert_allclose(np.asarray(o1), np.asarray(r1),
                               rtol=1e-2, atol=1e-2)

    # Case 2: f32 fallback (16-bit weights defeat the integer-exactness guard),
    # non-multiple-of-8 C_out, and several length tiles (tl_target=128).
    m2 = QuantMultiPrecActivConv1d(16, 6, wbits=[16], abits=[8],
                                   kernel_size=5, key=k3)
    m2.tl_target = 128
    x2 = 3.0 * jax.random.normal(k4, (2, 16, 300), jnp.float32)
    o2 = m2(x2)
    jax.block_until_ready(o2)
    assert o2.shape == (2, 6, 300 - 5 + 1)
    r2 = _reference_forward(m2, x2)
    jax.block_until_ready(r2)
    np.testing.assert_allclose(np.asarray(o2), np.asarray(r2),
                               rtol=1e-2, atol=1e-2)

    print("KERNEL_OK")
</pallas_src>

<mosaic_0001>
module attributes {stable_mosaic.version = 11 : i64} {
  func.func @_pact_conv1d_kernel(%arg0: i32, %arg1: i32, %arg2: i32, %arg3: memref<1x1x4x130xf32, #tpu.memory_space<vmem>>, %arg4: memref<3x8x128xbf16, #tpu.memory_space<vmem>>, %arg5: memref<8x1xf32, #tpu.memory_space<vmem>>, %arg6: memref<8x1xf32, #tpu.memory_space<vmem>>, %arg7: memref<1x8x128xf32, #tpu.memory_space<vmem>>, %arg8: memref<128x130xf32, #tpu.memory_space<vmem>>) attributes {dimension_semantics = [#tpu.dimension_semantics<parallel>, #tpu.dimension_semantics<parallel>, #tpu.dimension_semantics<parallel>], iteration_bounds = array<i64: 2, 1, 1>, scalar_prefetch = 0 : i64, scratch_operands = 1 : i64, tpu.core_type = #tpu.core_type<tc>, window_params = [{transform_indices = @transform_0, window_bounds = array<i64: 1, 1, 4, 130>}, {transform_indices = @transform_1, window_bounds = array<i64: 3, 8, 128>}, {transform_indices = @transform_2, window_bounds = array<i64: 8, 1>}, {transform_indices = @transform_3, window_bounds = array<i64: 8, 1>}, {transform_indices = @transform_4, window_bounds = array<i64: 1, 8, 128>}]} {
    %c0 = arith.constant 0 : index
    %c0_0 = arith.constant 0 : index
    %c0_1 = arith.constant 0 : index
    %c0_2 = arith.constant 0 : index
    %0 = vector.load %arg3[%c0, %c0_0, %c0_1, %c0_2] : memref<1x1x4x130xf32, #tpu.memory_space<vmem>>, vector<1x1x4x130xf32>
    %1 = vector.shape_cast %0 : vector<1x1x4x130xf32> to vector<4x130xf32>
    %cst = arith.constant 0.000000e+00 : f32
    %cst_3 = arith.constant 6.000000e+00 : f32
    %2 = vector.broadcast %cst : f32 to vector<4x130xf32>
    %3 = arith.maximumf %2, %1 : vector<4x130xf32>
    %4 = vector.broadcast %cst_3 : f32 to vector<4x130xf32>
    %5 = arith.minimumf %4, %3 : vector<4x130xf32>
    %cst_4 = arith.constant 2.500000e+00 : f32
    %6 = vector.broadcast %cst_4 : f32 to vector<4x130xf32>
    %7 = arith.mulf %6, %5 : vector<4x130xf32>
    %8 = math.floor %7 : vector<4x130xf32>
    %cst_5 = arith.constant 0.000000e+00 : f32
    %9 = vector.broadcast %cst_5 : f32 to vector<128x130xf32>
    %c0_6 = arith.constant 0 : index
    %c0_7 = arith.constant 0 : index
    %10 = vector.load %arg8[%c0_6, %c0_7] : memref<128x130xf32, #tpu.memory_space<vmem>>, vector<128x130xf32>
    tpu.vector_store %arg8[%c0_6, %c0_7], %9 {strides = array<i32>} : memref<128x130xf32, #tpu.memory_space<vmem>>, vector<128x130xf32>,
    %c0_8 = arith.constant 0 : index
    %c0_9 = arith.constant 0 : index
    %11 = vector.load %arg8[%c0_8, %c0_9] : memref<128x130xf32, #tpu.memory_space<vmem>>, vector<4x130xf32>
    tpu.vector_store %arg8[%c0_8, %c0_9], %8 {strides = array<i32>} : memref<128x130xf32, #tpu.memory_space<vmem>>, vector<4x130xf32>,
    %c0_10 = arith.constant 0 : index
    %c0_11 = arith.constant 0 : index
    %12 = vector.load %arg8[%c0_10, %c0_11] : memref<128x130xf32, #tpu.memory_space<vmem>>, vector<128x128xf32>
    %13 = arith.truncf %12 : vector<128x128xf32> to vector<128x128xbf16>
    %c0_12 = arith.constant 0 : index
    %c0_13 = arith.constant 0 : index
    %c0_14 = arith.constant 0 : index
    %14 = vector.load %arg4[%c0_12, %c0_13, %c0_14] : memref<3x8x128xbf16, #tpu.memory_space<vmem>>, vector<1x8x128xbf16>
    %15 = vector.shape_cast %14 : vector<1x8x128xbf16> to vector<8x128xbf16>
    %cst_15 = arith.constant dense<0.000000e+00> : vector<8x128xf32>
    %16 = tpu.matmul %15, %13, %cst_15 {dimension_numbers = #tpu.dot_dimension_numbers<[1], [0], [0], [1], [0, 0, 1, 1], [], []>} : vector<8x128xbf16>, vector<128x128xbf16>, vector<8x128xf32> -> vector<8x128xf32>
    %c0_16 = arith.constant 0 : index
    %c1 = arith.constant 1 : index
    %17 = vector.load %arg8[%c0_16, %c1] : memref<128x130xf32, #tpu.memory_space<vmem>>, vector<128x128xf32>
    %18 = arith.truncf %17 : vector<128x128xf32> to vector<128x128xbf16>
    %c1_17 = arith.constant 1 : index
    %c0_18 = arith.constant 0 : index
    %c0_19 = arith.constant 0 : index
    %19 = vector.load %arg4[%c1_17, %c0_18, %c0_19] : memref<3x8x128xbf16, #tpu.memory_space<vmem>>, vector<1x8x128xbf16>
    %20 = vector.shape_cast %19 : vector<1x8x128xbf16> to vector<8x128xbf16>
    %cst_20 = arith.constant dense<0.000000e+00> : vector<8x128xf32>
    %21 = tpu.matmul %20, %18, %cst_20 {dimension_numbers = #tpu.dot_dimension_numbers<[1], [0], [0], [1], [0, 0, 1, 1], [], []>} : vector<8x128xbf16>, vector<128x128xbf16>, vector<8x128xf32> -> vector<8x128xf32>
    %22 = arith.addf %16, %21 : vector<8x128xf32>
    %c0_21 = arith.constant 0 : index
    %c2 = arith.constant 2 : index
    %23 = vector.load %arg8[%c0_21, %c2] : memref<128x130xf32, #tpu.memory_space<vmem>>, vector<128x128xf32>
    %24 = arith.truncf %23 : vector<128x128xf32> to vector<128x128xbf16>
    %c2_22 = arith.constant 2 : index
    %c0_23 = arith.constant 0 : index
    %c0_24 = arith.constant 0 : index
    %25 = vector.load %arg4[%c2_22, %c0_23, %c0_24] : memref<3x8x128xbf16, #tpu.memory_space<vmem>>, vector<1x8x128xbf16>
    %26 = vector.shape_cast %25 : vector<1x8x128xbf16> to vector<8x128xbf16>
    %cst_25 = arith.constant dense<0.000000e+00> : vector<8x128xf32>
    %27 = tpu.matmul %26, %24, %cst_25 {dimension_numbers = #tpu.dot_dimension_numbers<[1], [0], [0], [1], [0, 0, 1, 1], [], []>} : vector<8x128xbf16>, vector<128x128xbf16>, vector<8x128xf32> -> vector<8x128xf32>
    %28 = arith.addf %22, %27 : vector<8x128xf32>
    %c0_26 = arith.constant 0 : index
    %c0_27 = arith.constant 0 : index
    %29 = vector.load %arg5[%c0_26, %c0_27] : memref<8x1xf32, #tpu.memory_space<vmem>>, vector<8x1xf32>
    %30 = vector.broadcast %29 : vector<8x1xf32> to vector<8x128xf32>
    %31 = arith.mulf %28, %30 : vector<8x128xf32>
    %c0_28 = arith.constant 0 : index
    %c0_29 = arith.constant 0 : index
    %32 = vector.load %arg6[%c0_28, %c0_29] : memref<8x1xf32, #tpu.memory_space<vmem>>, vector<8x1xf32>
    %33 = vector.broadcast %32 : vector<8x1xf32> to vector<8x128xf32>
    %34 = arith.addf %31, %33 : vector<8x128xf32>
    %c0_30 = arith.constant 0 : index
    %c0_31 = arith.constant 0 : index
    %c0_32 = arith.constant 0 : index
    %35 = vector.load %arg7[%c0_30, %c0_31, %c0_32] : memref<1x8x128xf32, #tpu.memory_space<vmem>>, vector<1x8x128xf32>
    %36 = vector.shape_cast %35 : vector<1x8x128xf32> to vector<8x128xf32>
    %37 = vector.shape_cast %34 : vector<8x128xf32> to vector<1x8x128xf32>
    tpu.vector_store %arg7[%c0_30, %c0_31, %c0_32], %37 {strides = array<i32>} : memref<1x8x128xf32, #tpu.memory_space<vmem>>, vector<1x8x128xf32>,
    return
  }
  func.func @transform_0(%arg0: i32, %arg1: i32, %arg2: i32) -> (i32, i32, i32, i32) {
    %c0_i32 = arith.constant 0 : i32
    %c0_i32_0 = arith.constant 0 : i32
    %c0_i32_1 = arith.constant 0 : i32
    return %arg0, %arg2, %c0_i32, %c0_i32_0 : i32, i32, i32, i32
  }
  func.func @transform_1(%arg0: i32, %arg1: i32, %arg2: i32) -> (i32, i32, i32) {
    %c0_i32 = arith.constant 0 : i32
    %c0_i32_0 = arith.constant 0 : i32
    %c0_i32_1 = arith.constant 0 : i32
    return %c0_i32, %arg1, %c0_i32_0 : i32, i32, i32
  }
  func.func @transform_2(%arg0: i32, %arg1: i32, %arg2: i32) -> (i32, i32) {
    %c0_i32 = arith.constant 0 : i32
    %c0_i32_0 = arith.constant 0 : i32
    return %arg1, %c0_i32 : i32, i32
  }
  func.func @transform_3(%arg0: i32, %arg1: i32, %arg2: i32) -> (i32, i32) {
    %c0_i32 = arith.constant 0 : i32
    %c0_i32_0 = arith.constant 0 : i32
    return %arg1, %c0_i32 : i32, i32
  }
  func.func @transform_4(%arg0: i32, %arg1: i32, %arg2: i32) -> (i32, i32, i32) {
    %c0_i32 = arith.constant 0 : i32
    return %arg0, %arg1, %arg2 : i32, i32, i32
  }
}

</mosaic_0001>

<bundles_post_ra>
// kernel: tpu_custom_call.1
= control target key start
LH: loop header
LB: loop body
LE: loop exit
PB: predicated region body
PF: predicated region fallthrough
CT: control target
= control target key end

     0   :  { %9 = vsyncpa [#allocation4], 0  ;;  %s1351_s0 = inlined_call_operand.vmem [shape: f32[2,1,4,130], index: 0, kind: input, shape index: {}]   ;;  %s1352_s1 = inlined_call_operand.hbm [shape: bf16[3,8,128], index: 1, kind: input, shape index: {}]   ;;  %s1353_s2 = inlined_call_operand.vmem [shape: f32[8,1], index: 2, kind: input, shape index: {}]   ;;  %s1354_s3 = inlined_call_operand.vmem [shape: f32[8,1], index: 3, kind: input, shape index: {}]   ;;  %s1355_s4 = inlined_call_operand.hbm [shape: f32[2,8,128], index: 4, kind: output, shape index: {}]  }
   0x1   :  { %10 = vsyncpa [#allocation5], 0 }
   0x2   :  { %12 = vsyncpa [#allocation5 + $0x1], 0  ;;  %s1100_s15 = smov 0   ;;  %s1102_s16 = smov 0  }
   0x3   :  { %s1104_s17 = smov 0   ;;  %s1106_s18 = smov 0  }
   0x4   :  { %s1108_s19 = smov 0   ;;  %s1110_s20 = smov 0  }
   0x5 LB: > { %s778_s21 = sadd.s32 4294967295, %s1063_s20   ;;  %s779_s22 = sadd.s32 4294967294, %s1063_s20   ;;  %s1063_s20 = sphi %s1110_s20, %s18_s20   ;;  %s1059_s19 = sphi %s1108_s19, %s1364_s19   ;;  %s1055_s18 = sphi %s1106_s18, %s1363_s18   ;;  %s1051_s17 = sphi %s1104_s17, %s1362_s17   ;;  %s1047_s16 = sphi %s1102_s16, %s1361_s16   ;;  %s1043_s15 = sphi %s1100_s15, %s1360_s15  }
   0x6   : > { %s37_s23 = sadd.s32 1, %s1059_s19  ;;  %s154_s24 = sadd.s32 1, %s1051_s17 }
   0x7   : > { %p39_p0 = scmp.ge.s32.totalorder %s37_s23, 2  ;;  %p164_p1 = scmp.ne.s32.totalorder %s1051_s17, %s1047_s16 }
   0x8   : > { %p165_p2 = scmp.eq.s32.totalorder %s778_s21, 1  ;;  %p170_p3 = scmp.ne.s32.totalorder %s1047_s16, %s1043_s15 }
   0x9   : > { %s1366_s23 = smov (%p39_p0, %s37_s23), 0  ;;  %p171_p5 = scmp.eq.s32.totalorder %s779_s22, 1 }
   0xa   : > { %p1140_p4 = por %p165_p2, %p164_p1  ;;  %s147_s26 = ssub.s32 %s1059_s19, %s1366_s23 }
   0xb   : > { %p780_p6 = scmp.ge.s32.totalorder %s1063_s20, 1  ;;  %p152_p7 = scmp.eq.s32.totalorder %s147_s26, 0 }
   0xc   : > { %p1147_p8 = por %p171_p5, %p170_p3  ;;  %p178_p9 = scmp.lt.s32.totalorder %s1063_s20, 3 }
   0xd   : > { %s1153_s28 = scalar_select %p152_p7, %s1051_s17, %s154_s24  }
   0xe   : > { %p1155_p10 = pnand %p780_p6, %p178_p9  ;;  %p1159_p11 = scmp.eq.s32.totalorder %s778_s21, 0 }
   0xf   : > { %s1065_s5 = smov [#allocation3]  }
  0x10   : > { %p888_p12 = pneg %p1155_p10  ;;  %s192_s6 = sshll.u32 %s1065_s5, 4  ;;  %s193_s6 = int_to_ptr.vmem [resolvable:$true] %s192_s6 }
  0x11   : > { %s968_s7 = scalar_lea.vmem %s193_s6, 192  ;;  %p976_p5 = scmp.lt.s32.totalorder %s193_s6, %s193_s6 }
  0x12   : > { %p889_p13 = pnand %p1159_p11, %p888_p12  ;;  %p969_p1 = scmp.ne.s32.totalorder %s193_s6, %s968_s7 }
  0x13   : > { %p977_p6 = scmp.lt.s32.totalorder %s968_s7, %s968_s7 }
  0x14   : > { %p959_p0 = pneg %p889_p13 }
  0x15   : > { %p978_p7 = por %p977_p6, %p976_p5 }
  0x16   : > { %p971_p2 = pnand %p969_p1, %p959_p0 }
  0x18   : > { %p972_p3 = pneg %p971_p2 }
  0x1a   : > { %p979_p9 = pnand %p978_p7, %p972_p3 }
  0x1c   : > { %982 = shalt.err (!%p979_p9)
}
  0x1d   : > { %s1066_s8 = smov 64   ;;  %s1067_s9 = smov 4  }
  0x1e   : > { %891 = dma.hbm_to_vmem [thread:$0]  (!%p889_p13), %s1352_s1, 192, %s193_s6, [#allocation4], %s1066_s8, %s1066_s8, %s1067_s9  }
  0x1f   : > { %234 = sbr.rel (%p1155_p10) target bundleno = 443 (0x1bb), region = 36 }
  0x24   : > { %1034 = dma.done.wait (%p1159_p11), [#allocation4], 192  }
  0x25   : > { %1036 = vsyncadd (%p1159_p11), [#allocation4], 4294967104  ;;  %vm296_vm0 = vcmask 15360   ;;  %p272_p12 = scmp.lt.s32.totalorder %s1055_s18, 1  ;;  %v1068_v0 = vmov 0.0   ;;  %v1069_v1 = vmov 0.0|0.0  }
  0x26   : > { %295 = vst [vmem:[#allocation2] sm:$0xff] %v1068_v0  ;;  %325 = vst.msk [vmem:[#allocation2 + $0xe8] sm:$0xff] %vm296_vm0, %v1068_v0  ;;  %822 = vmatprep.subr.bf16.mxu0 %v1068_v0  ;;  %842 = vmatprep.subr.bf16.mxu1 %v1068_v0  ;;  %s1070_s13 = smov 127   ;;  %vm332_vm1 = vcmask 11264   ;;  %vm1071_vm2 = vmmov 0   ;;  %s1072_s26 = smov 126  }
  0x27   : > { %327 = vst.msk [vmem:[#allocation2 + $0xf8] sm:$0xff] %vm296_vm0, %v1068_v0  ;;  %297 = vst.msk [vmem:[#allocation2 + $0x8] sm:$0xff] %vm296_vm0, %v1068_v0  ;;  %s273_s12 = scalar_select %p272_p12, %s1055_s18, 1  ;;  %429 = vrot.lane.b32.xlu0 %v1069_v1, %s1070_s13  ;;  %425 = vrot.lane.b32.xlu1 %v1069_v1, %s1070_s13  ;;  %v358_v34 = vld [vmem:[#allocation3] sm:$0xf]  ;;  %v1073_v35 = vmov 0  }
  0x28   : > { %299 = vst.msk [vmem:[#allocation2 + $0x18] sm:$0xff] %vm296_vm0, %v1068_v0  ;;  %301 = vst.msk [vmem:[#allocation2 + $0x28] sm:$0xff] %vm296_vm0, %v1068_v0  ;;  %843 = vmatpush3.bf16.msra.mxu1 %v1069_v1  ;;  %838 = vmatprep.mubr.msk.bf16.mxu0 %vm1071_vm2, %v1068_v0  ;;  %v622_v36 = vld [vmem:[%s1353_s2] sm:$0xff]  ;;  %vm433_vm3 = vcmask 1039360   ;;  %vm564_vm4 = vcmask 1031168   ;;  %s269_s7 = sand.u32 1, %s1047_s16  }
  0x29   : > { %303 = vst.msk [vmem:[#allocation2 + $0x38] sm:$0xff] %vm296_vm0, %v1068_v0  ;;  %305 = vst.msk [vmem:[#allocation2 + $0x48] sm:$0xff] %vm296_vm0, %v1068_v0  ;;  %s794_s14 = sshll.u32 %s273_s12, 3  ;;  %844 = vmatprep.subr.bf16.mxu1 %v1068_v0  ;;  %858 = vmatprep.mubr.msk.bf16.mxu1 %vm1071_vm2, %v1068_v0  ;;  %v629_v37 = vld [vmem:[%s1354_s3] sm:$0xff]  ;;  %s787_s8 = sshll.u32 %s269_s7, 3 }
  0x2a   : > { %307 = vst.msk [vmem:[#allocation2 + $0x58] sm:$0xff] %vm296_vm0, %v1068_v0  ;;  %309 = vst.msk [vmem:[#allocation2 + $0x68] sm:$0xff] %vm296_vm0, %v1068_v0  ;;  %s280_s24 = scalar_lea.vmem %s1351_s0, %s794_s14  ;;  %956 = vset.pattern.permute.xlu1 %v1073_v35  ;;  %955 = vset.pattern.permute.xlu0 %v1073_v35  ;;  %s791_s9 = sshll.u32 %s1055_s18, 7 }
  0x2b   : > { %311 = vst.msk [vmem:[#allocation2 + $0x78] sm:$0xff] %vm296_vm0, %v1068_v0  ;;  %313 = vst.msk [vmem:[#allocation2 + $0x88] sm:$0xff] %vm296_vm0, %v1068_v0  ;;  %v290_v2 = vld [vmem:[%s280_s24] sm:$0xff]  ;;  %s271_s10 = scalar_lea.vmem [#allocation6], %s787_s8  ;;  %s1311_s14 = scalar_lea.hbm %s1355_s4, %s791_s9 }
  0x2c   : > { %315 = vst.msk [vmem:[#allocation2 + $0x98] sm:$0xff] %vm296_vm0, %v1068_v0  ;;  %317 = vst.msk [vmem:[#allocation2 + $0xa8] sm:$0xff] %vm296_vm0, %v1068_v0  ;;  %v291_v6 = vmax.f32 %v290_v2, 0.0  ;;  %845 = vmatpush3.bf16.msra.mxu1 %v1069_v1  ;;  %s653_s11 = sshll.u32 %s271_s10, 4  ;;  %s638_s21 = scalar_lea.sflag [#allocation5], %s269_s7  ;;  %s654_s11 = int_to_ptr.vmem [resolvable:$true] %s653_s11 }
  0x2d   : > { %319 = vst.msk [vmem:[#allocation2 + $0xb8] sm:$0xff] %vm296_vm0, %v1068_v0  ;;  %321 = vst.msk [vmem:[#allocation2 + $0xc8] sm:$0xff] %vm296_vm0, %v1068_v0  ;;  %v373_v3 = vld [vmem:[#allocation2 + $0xe8] sm:$0xff]  ;;  %846 = vmatprep.subr.bf16.mxu1 %v1068_v0  ;;  %s983_s22 = scalar_lea.vmem %s654_s11, 128  ;;  %s1074_s18 = smov [#allocation6]  }
  0x2e   : > { %323 = vst.msk [vmem:[#allocation2 + $0xd8] sm:$0xff] %vm296_vm0, %v1068_v0  ;;  %v374_v4 = vld [vmem:[#allocation2 + $0xf8] sm:$0xff]  ;;  %v292_v12 = vmin.f32 %v291_v6, 6.0  ;;  %p984_p10 = scmp.ne.s32.totalorder %s654_s11, %s983_s22  ;;  %s987_s24 = sshll.u32 %s1074_s18, 4  ;;  %s988_s24 = int_to_ptr.vmem [resolvable:$false] %s987_s24 }
  0x2f   : > { %v382_v7 = vpack.c.bf16 %v374_v4, %v373_v3  ;;  %v361_v26 = vld [vmem:[#allocation2 + $0x28] sm:$0xff]  ;;  %v360_v31 = vld [vmem:[#allocation2 + $0x18] sm:$0xff]  ;;  %p990_p0 = scmp.lt.s32.totalorder %s654_s11, %s988_s24 }
  0x30   : > { %v293_v14 = vmul.f32 2.5, %v292_v12  ;;  %847 = vmatpush3.bf16.msra.mxu1 %v1069_v1  ;;  %v363_v23 = vld [vmem:[#allocation2 + $0x48] sm:$0xff]  ;;  %v362_v27 = vld [vmem:[#allocation2 + $0x38] sm:$0xff]  ;;  %p985_p11 = pnand %p984_p10, %p1140_p4 }
  0x31   : > { %431 = vrot.lane.b32.xlu0 %v382_v7, %s1070_s13  ;;  %848 = vmatprep.subr.bf16.mxu1 %v1068_v0  ;;  %v365_v20 = vld [vmem:[#allocation2 + $0x68] sm:$0xff]  ;;  %v364_v24 = vld [vmem:[#allocation2 + $0x58] sm:$0xff]  ;;  %v376_v29 = vpack.c.bf16 %v362_v27, %v361_v26 }
  0x32   : > { %v367_v15 = vld [vmem:[#allocation2 + $0x88] sm:$0xff]  ;;  %v294_v17 = vfloor.f32 %v293_v14  ;;  %v366_v21 = vld [vmem:[#allocation2 + $0x78] sm:$0xff]  ;;  %v377_v25 = vpack.c.bf16 %v364_v24, %v363_v23  ;;  %p986_p13 = pneg %p985_p11 }
  0x33   : > { %v369_v9 = vld [vmem:[#allocation2 + $0xa8] sm:$0xff]  ;;  %v368_v16 = vld [vmem:[#allocation2 + $0x98] sm:$0xff]  ;;  %v378_v22 = vpack.c.bf16 %v366_v21, %v365_v20 }
  0x34   : > { %v371_v5 = vld [vmem:[#allocation2 + $0xc8] sm:$0xff]  ;;  %v370_v10 = vld [vmem:[#allocation2 + $0xb8] sm:$0xff]  ;;  %v379_v18 = vpack.c.bf16 %v368_v16, %v367_v15  ;;  %331 = vst [vmem:[#allocation2] sm:$0xf] %v294_v17  ;;  %v329_v19 = vcombine.high %v294_v17, %v294_v17  ;;  %849 = vmatpush3.bf16.msra.mxu1 %v1069_v1 }
  0x35   : > { %v372_v8 = vld [vmem:[#allocation2 + $0xd8] sm:$0xff]  ;;  %v380_v13 = vpack.c.bf16 %v370_v10, %v369_v9  ;;  %421 = vrot.lane.b32.xlu0 %v1069_v1, %s1070_s13  ;;  %850 = vmatprep.subr.bf16.mxu1 %v1068_v0  ;;  %v531_v24 = vld [vmem:[#allocation3 + $0x8] sm:$0xf] }
  0x36   : > { %v381_v11 = vpack.c.bf16 %v372_v8, %v371_v5  ;;  %333 = vst.msk [vmem:[#allocation2 + $0x8] sm:$0xf] %vm332_vm1, %v329_v19 }
  0x38   : > { %427 = vrot.lane.b32.xlu1 %v381_v11, %s1070_s13  ;;  %851 = vmatpush3.bf16.msra.mxu1 %v1069_v1 }
  0x39   : > { %417 = vrot.lane.b32.xlu0 %v1069_v1, %s1070_s13  ;;  %852 = vmatprep.subr.bf16.mxu1 %v1068_v0 }
  0x3b   : > { %v334_v28 = vld [vmem:[#allocation2] sm:$0xff] }
  0x3c   : > { %423 = vrot.lane.b32.xlu1 %v380_v13, %s1070_s13  ;;  %853 = vmatpush3.bf16.msra.mxu1 %v1069_v1  ;;  %v350_v32 = vpack.c.bf16 %v1068_v0, %v334_v28 }
  0x3d   : > { %413 = vrot.lane.b32.xlu0 %v1069_v1, %s1070_s13  ;;  %854 = vmatprep.subr.bf16.mxu1 %v1068_v0  ;;  %v359_v30 = vld [vmem:[#allocation2 + $0x8] sm:$0xff] }
  0x3e   : > { %v375_v33 = vpack.c.bf16 %v360_v31, %v359_v30 }
  0x40   : > { %419 = vrot.lane.b32.xlu1 %v379_v18, %s1070_s13  ;;  %855 = vmatpush3.bf16.msra.mxu1 %v1069_v1 }
  0x41   : > { %409 = vrot.lane.b32.xlu0 %v1069_v1, %s1070_s13  ;;  %856 = vmatprep.subr.bf16.mxu1 %v1068_v0 }
  0x44   : > { %415 = vrot.lane.b32.xlu1 %v378_v22, %s1070_s13  ;;  %857 = vmatpush3.bf16.msra.mxu1 %v350_v32 }
  0x45   : > { %405 = vrot.lane.b32.xlu0 %v1069_v1, %s1070_s13 }
  0x47   : > { %859 = vmatmul.mubr.bf16.vlgmr.msra.gmra.mxu1 %v358_v34 }
  0x48   : > { %411 = vrot.lane.b32.xlu1 %v377_v25, %s1070_s13 }
  0x49   : > { %401 = vrot.lane.b32.xlu0 %v350_v32, %s1070_s13 }
  0x4c   : > { %407 = vrot.lane.b32.xlu1 %v376_v29, %s1070_s13 }
  0x4d   : > { %560 = vrot.lane.b32.xlu0 %v1069_v1, %s1072_s26 }
  0x50   : > { %403 = vrot.lane.b32.xlu1 %v375_v33, %s1070_s13 }
  0x51   : > { %556 = vrot.lane.b32.xlu0 %v1069_v1, %s1072_s26 }
  0x54   : > { %562 = vrot.lane.b32.xlu1 %v382_v7, %s1072_s26 }
  0x55   : > { %552 = vrot.lane.b32.xlu0 %v1069_v1, %s1072_s26 }
  0x58   : > { %558 = vrot.lane.b32.xlu1 %v381_v11, %s1072_s26 }
  0x59   : > { %548 = vrot.lane.b32.xlu0 %v1069_v1, %s1072_s26 }
  0x5c   : > { %554 = vrot.lane.b32.xlu1 %v380_v13, %s1072_s26 }
  0x5d   : > { %544 = vrot.lane.b32.xlu0 %v1069_v1, %s1072_s26 }
  0x60   : > { %550 = vrot.lane.b32.xlu1 %v379_v18, %s1072_s26 }
  0x61   : > { %540 = vrot.lane.b32.xlu0 %v1069_v1, %s1072_s26 }
  0x64   : > { %546 = vrot.lane.b32.xlu1 %v378_v22, %s1072_s26 }
  0x65   : > { %536 = vrot.lane.b32.xlu0 %v1069_v1, %s1072_s26  ;;  %v384_v1 = vld [vmem:[#allocation3 + $0x4] sm:$0xf] }
  0x68   : > { %542 = vrot.lane.b32.xlu1 %v377_v25, %s1072_s26 }
  0x69   : > { %532 = vrot.lane.b32.xlu0 %v350_v32, %s1072_s26 }
  0x6c   : > { %538 = vrot.lane.b32.xlu1 %v376_v29, %s1072_s26 }
  0x6d   : > { %625 = vperm.xlu0 %955, %v622_v36  }
  0x70   : > { %534 = vrot.lane.b32.xlu1 %v375_v33, %s1072_s26  ;;  %s989_s26 = scalar_lea.vmem %s988_s24, 256 }
  0x71   : > { %p991_p1 = scmp.lt.s32.totalorder %s989_s26, %s983_s22 }
  0x73   : > { %p992_p2 = por %p991_p1, %p990_p0 }
  0x74   : > { %632 = vperm.xlu1 %956, %v629_v37  }
  0x75   : > { %p993_p3 = pnand %p992_p2, %p986_p13 }
  0x99   : > { %v430_v38 = vpop.permute.xlu0 %429  ;;  %v426_v39 = vpop.permute.xlu1 %425 }
  0xa3   : > { %v432_v40 = vpop.permute.xlu0 %431 }
  0xa4   : > { %v441_v42 = vsel %vm433_vm3, %v430_v38, %v432_v40 }
  0xa5   : > { %823 = vmatpush3.bf16.msra.mxu0 %v441_v42 }
  0xa6   : > { %824 = vmatprep.subr.bf16.mxu0 %v1068_v0 }
  0xa7   : > { %v422_v43 = vpop.permute.xlu0 %421 }
  0xaa   : > { %v428_v41 = vpop.permute.xlu1 %427 }
  0xab   : > { %v440_v44 = vsel %vm433_vm3, %v426_v39, %v428_v41  ;;  %v418_v47 = vpop.permute.xlu0 %417 }
  0xac   : > { %825 = vmatpush3.bf16.msra.mxu0 %v440_v44 }
  0xad   : > { %826 = vmatprep.subr.bf16.mxu0 %v1068_v0 }
  0xae   : > { %v424_v45 = vpop.permute.xlu1 %423 }
  0xaf   : > { %v439_v46 = vsel %vm433_vm3, %v422_v43, %v424_v45  ;;  %v414_v50 = vpop.permute.xlu0 %413 }
  0xb0   : > { %827 = vmatpush3.bf16.msra.mxu0 %v439_v46 }
  0xb1   : > { %828 = vmatprep.subr.bf16.mxu0 %v1068_v0 }
  0xb2   : > { %v420_v48 = vpop.permute.xlu1 %419 }
  0xb3   : > { %v438_v49 = vsel %vm433_vm3, %v418_v47, %v420_v48  ;;  %v410_v53 = vpop.permute.xlu0 %409 }
  0xb4   : > { %829 = vmatpush3.bf16.msra.mxu0 %v438_v49 }
  0xb5   : > { %830 = vmatprep.subr.bf16.mxu0 %v1068_v0 }
  0xb6   : > { %v416_v51 = vpop.permute.xlu1 %415 }
  0xb7   : > { %v437_v52 = vsel %vm433_vm3, %v414_v50, %v416_v51  ;;  %v406_v56 = vpop.permute.xlu0 %405 }
  0xb8   : > { %831 = vmatpush3.bf16.msra.mxu0 %v437_v52 }
  0xb9   : > { %832 = vmatprep.subr.bf16.mxu0 %v1068_v0 }
  0xba   : > { %v412_v54 = vpop.permute.xlu1 %411 }
  0xbb   : > { %v436_v55 = vsel %vm433_vm3, %v410_v53, %v412_v54  ;;  %v402_v59 = vpop.permute.xlu0 %401 }
  0xbc   : > { %833 = vmatpush3.bf16.msra.mxu0 %v436_v55 }
  0xbd   : > { %834 = vmatprep.subr.bf16.mxu0 %v1068_v0 }
  0xbe   : > { %v408_v57 = vpop.permute.xlu1 %407 }
  0xbf   : > { %v435_v58 = vsel %vm433_vm3, %v406_v56, %v408_v57  ;;  %v561_v62 = vpop.permute.xlu0 %560 }
  0xc0   : > { %835 = vmatpush3.bf16.msra.mxu0 %v435_v58 }
  0xc1   : > { %836 = vmatprep.subr.bf16.mxu0 %v1068_v0 }
  0xc2   : > { %v404_v60 = vpop.permute.xlu1 %403 }
  0xc3   : > { %v434_v61 = vsel %vm433_vm3, %v402_v59, %v404_v60  ;;  %v557_v3 = vpop.permute.xlu0 %556 }
  0xc4   : > { %837 = vmatpush3.bf16.msra.mxu0 %v434_v61 }
  0xc5   : > { %862 = vmatprep.subr.bf16.mxu0 %v1068_v0 }
  0xc6   : > { %v563_v63 = vpop.permute.xlu1 %562 }
  0xc7   : > { %v572_v2 = vsel %vm564_vm4, %v561_v62, %v563_v63  ;;  %839 = vmatmul.mubr.bf16.vlgmr.msra.gmra.mxu0 %v384_v1  ;;  %v553_v6 = vpop.permute.xlu0 %552 }
  0xc8   : > { %863 = vmatpush3.bf16.msra.mxu0 %v572_v2  ;;  %878 = vmatprep.mubr.msk.bf16.mxu0 %vm1071_vm2, %v1068_v0 }
  0xc9   : > { %864 = vmatprep.subr.bf16.mxu0 %v1068_v0 }
  0xca   : > { %v559_v4 = vpop.permute.xlu1 %558 }
  0xcb   : > { %v571_v5 = vsel %vm564_vm4, %v557_v3, %v559_v4  ;;  %v549_v9 = vpop.permute.xlu0 %548 }
  0xcc   : > { %865 = vmatpush3.bf16.msra.mxu0 %v571_v5 }
  0xcd   : > { %866 = vmatprep.subr.bf16.mxu0 %v1068_v0 }
  0xce   : > { %v555_v7 = vpop.permute.xlu1 %554 }
  0xcf   : > { %v570_v8 = vsel %vm564_vm4, %v553_v6, %v555_v7  ;;  %v545_v12 = vpop.permute.xlu0 %544 }
  0xd0   : > { %867 = vmatpush3.bf16.msra.mxu0 %v570_v8 }
  0xd1   : > { %868 = vmatprep.subr.bf16.mxu0 %v1068_v0 }
  0xd2   : > { %v551_v10 = vpop.permute.xlu1 %550 }
  0xd3   : > { %v569_v11 = vsel %vm564_vm4, %v549_v9, %v551_v10  ;;  %v541_v15 = vpop.permute.xlu0 %540 }
  0xd4   : > { %869 = vmatpush3.bf16.msra.mxu0 %v569_v11 }
  0xd5   : > { %870 = vmatprep.subr.bf16.mxu0 %v1068_v0 }
  0xd6   : > { %v547_v13 = vpop.permute.xlu1 %546 }
  0xd7   : > { %v568_v14 = vsel %vm564_vm4, %v545_v12, %v547_v13  ;;  %v537_v18 = vpop.permute.xlu0 %536 }
  0xd8   : > { %871 = vmatpush3.bf16.msra.mxu0 %v568_v14 }
  0xd9   : > { %872 = vmatprep.subr.bf16.mxu0 %v1068_v0 }
  0xda   : > { %v543_v16 = vpop.permute.xlu1 %542 }
  0xdb   : > { %v567_v17 = vsel %vm564_vm4, %v541_v15, %v543_v16  ;;  %v533_v21 = vpop.permute.xlu0 %532 }
  0xdc   : > { %873 = vmatpush3.bf16.msra.mxu0 %v567_v17 }
  0xdd   : > { %874 = vmatprep.subr.bf16.mxu0 %v1068_v0 }
  0xde   : > { %v539_v19 = vpop.permute.xlu1 %538 }
  0xdf   : > { %v566_v20 = vsel %vm564_vm4, %v537_v18, %v539_v19 }
  0xe0   : > { %875 = vmatpush3.bf16.msra.mxu0 %v566_v20 }
  0xe1   : > { %876 = vmatprep.subr.bf16.mxu0 %v1068_v0 }
  0xe2   : > { %v535_v22 = vpop.permute.xlu1 %534 }
  0xe3   : > { %v565_v23 = vsel %vm564_vm4, %v533_v21, %v535_v22 }
  0xe4   : > { %877 = vmatpush3.bf16.msra.mxu0 %v565_v23 }
  0xe7   : > { %879 = vmatmul.mubr.bf16.vlgmr.msra.gmra.mxu0 %v531_v24 }
  0xe8   : > { %v626_v35 = vpop.permute.xlu0 %625 }
  0xef   : > { %v633_v37 = vpop.permute.xlu1 %632 }
 0x107   : > { %v524_v25 = vpop.f32.mrf.mxu1 }
 0x109   : > { %v860_v26 = vpop.f32.mrf.mxu1 }
 0x10b   : > { %v527_v27 = vpop.f32.mrf.mxu1 }
 0x10d   : > { %v861_v28 = vpop.f32.mrf.mxu1 }
 0x187   : > { %v484_v29 = vpop.f32.mrf.mxu0 }
 0x188   : > { %v525_v33 = vadd.f32 %v524_v25, %v484_v29 }
 0x189   : > { %v840_v30 = vpop.f32.mrf.mxu0 }
 0x18b   : > { %v487_v31 = vpop.f32.mrf.mxu0 }
 0x18d   : > { %v841_v32 = vpop.f32.mrf.mxu0 }
 0x1a7   : > { %v615_v34 = vpop.f32.mrf.mxu0 }
 0x1a8   : > { %v621_v36 = vadd.f32 %v615_v34, %v525_v33 }
 0x1a9   : > { %v880_v0 = vpop.f32.mrf.mxu0 }
 0x1aa   : > { %v628_v38 = vmul.f32 %v626_v35, %v621_v36 }
 0x1ab   : > { %v618_v39 = vpop.f32.mrf.mxu0 }
 0x1ac   : > { %v635_v40 = vadd.f32 %v633_v37, %v628_v38 }
 0x1ad   : > { %v881_v41 = vpop.f32.mrf.mxu0 }
 0x1ae   : > { %636 = vst [vmem:[%s271_s10] sm:$0xff] %v635_v40 }
 0x1af   : > { %996 = shalt.err (!%p993_p3)
}
 0x1b0   : > { %s997_s29 = scalar_lea.hbm %s1311_s14, 128  ;;  %s1001_s6 = scalar_lea.hbm %s1355_s4, 256 }
 0x1b1   : > { %p998_p5 = scmp.ne.s32.totalorder %s1311_s14, %s997_s29  ;;  %p1002_p9 = scmp.lt.s32.totalorder %s1311_s14, %s1355_s4 }
 0x1b2   : > { %p1003_p12 = scmp.lt.s32.totalorder %s1001_s6, %s997_s29 }
 0x1b3   : > { %p999_p6 = pnand %p998_p5, %p1140_p4 }
 0x1b4   : > { %p1004_p10 = por %p1003_p12, %p1002_p9 }
 0x1b5   : > { %p1000_p7 = pneg %p999_p6 }
 0x1b7   : > { %p1005_p11 = pnand %p1004_p10, %p1000_p7 }
 0x1b9   : > { %1008 = shalt.err (!%p1005_p11)
}
 0x1ba   : > { %886 = dma.vmem_to_hbm [thread:$0]  (%p1140_p4), %s654_s11, 128, %s1311_s14, %s638_s21  }
 0x1bb PF: > { %p898_p13 = scmp.ge.s32.totalorder %s1063_s20, 2  ;;  %s665_s9 = sand.u32 1, %s1043_s15  }
 0x1bc   : > { %s666_s10 = scalar_lea.sflag [#allocation5], %s665_s9 }
 0x1bd   : > { %p893_p0 = pnand %p898_p13, %p1147_p8 }
 0x1bf   : > { %p894_p1 = pneg %p893_p0 }
 0x1c1   : > { %1038 = dma.done.wait (%p894_p1), %s666_s10, 128  }
 0x1c2   : > { %1040 = vsyncadd (%p894_p1), %s666_s10, 4294967168  ;;  %s18_s20 = sadd.s32 1, %s1063_s20   ;;  %s1360_s15 = smov %s1047_s16 }
 0x1c3   : > { %p15_p2 = scmp.ge.s32.totalorder %s18_s20, 4   ;;  %s1361_s16 = smov %s1051_s17 }
 0x1c4   : > { %s1362_s17 = smov %s1153_s28  ;;  %s1363_s18 = smov %s1059_s19 }
 0x1c5   : > { %s1364_s19 = smov %s1366_s23  ;;  %17 = sbr.rel (!%p15_p2) target bundleno = 5 (0x5), region = 85 }
 0x1ca   :  { %671 = vsyncpa [#allocation4], 1 }
 0x1cb   :  { %673 = vsyncpa [#allocation4 + $0x1], 1 }
 0x1cc   :  { %674 = vsyncpa [#allocation5], 1 }
 0x1cd   :  { %676 = vsyncpa [#allocation5 + $0x1], 1 }

</bundles_post_ra>
